<compile_context>
chip_gen: v7x
topology: tpu7x:2x2x1
jax: 0.10.0
libtpu: 0.0.40
codegen_flags: <defaults>
</compile_context>

<pallas_src>
import functools

import numpy as np
import jax
import jax.numpy as jnp
from jax.experimental import pallas as pl
from jax.experimental.pallas import tpu as pltpu

EPS = 1e-5  # PyTorch GroupNorm default eps


def _odefunc_kernel(t_ref, x_ref, m_ref,
                    g1_ref, b1_ref, w1_ref, cb1_ref,
                    g2_ref, b2_ref, w2_ref, cb2_ref,
                    g3_ref, b3_ref,
                    out_ref,
                    *, C, H, W, G, NB):
    HW = H * W
    L = NB * HW
    t = t_ref[0]                 # scalar f32 from SMEM
    x = x_ref[0]                 # (C, L) f32
    masks = m_ref[...]           # (9, L) f32 zero-padding masks (1 inside image, 0 outside)
    t_rows = masks * t           # (9, L): t-channel rows of the stacked patch, shared by both convs

    def group_norm(z, gamma, beta, relu):
        # Per-sample (lane segment of HW), per-group stats; biased variance like PyTorch.
        inv_cnt = 1.0 / float((C // G) * HW)
        outs = []
        for n in range(NB):                                  # NB is small & static
            zn = z[:, n * HW:(n + 1) * HW]                   # (C, HW) lane-aligned slice
            s1 = jnp.sum(zn, axis=1, keepdims=True)          # (C, 1)
            s2 = jnp.sum(zn * zn, axis=1, keepdims=True)     # (C, 1)
            if C != G:                                       # combine channels within a group
                s1 = jnp.sum(s1.reshape(G, C // G, 1), axis=1)
                s2 = jnp.sum(s2.reshape(G, C // G, 1), axis=1)
            mean = s1 * inv_cnt
            var = jnp.maximum(s2 * inv_cnt - mean * mean, 0.0)
            inv = jax.lax.rsqrt(var + EPS)                   # (G, 1)
            if C != G:                                       # broadcast group -> channels (tiny)
                mean = jnp.broadcast_to(mean[:, None, :], (G, C // G, 1)).reshape(C, 1)
                inv = jnp.broadcast_to(inv[:, None, :], (G, C // G, 1)).reshape(C, 1)
            a = gamma * inv                                  # (C, 1) fused scale
            b = beta - mean * a                              # (C, 1) fused shift
            o = zn * a + b
            if relu:
                o = jnp.maximum(o, 0.0)
            outs.append(o)
        return outs[0] if NB == 1 else jnp.concatenate(outs, axis=1)

    def concat_conv(act, w_ref, bias_ref):
        # 3x3 / stride 1 / pad 1 conv of concat([ones*t, act]) as a single MXU matmul:
        #   patches (9 + 9*C, L) = [t*mask_k rows ; mask_k * shifted_act_k rows]
        #   W_flat  (C, 9 + 9*C)  bf16, prepared on the host to match this row order.
        rows = [t_rows]
        for k in range(9):
            dy, dx = k // 3 - 1, k % 3 - 1
            off = dy * W + dx                                # flattened lane offset of this tap
            if off == 0:
                shifted = act
            else:
                # shifted[i] = act[(i + off) mod L]; wrap-around hits only masked border taps.
                shifted = pltpu.roll(act, shift=(-off) % L, axis=1)
            rows.append(shifted * masks[k:k + 1, :])
        patches = jnp.concatenate(rows, axis=0).astype(jnp.bfloat16)   # (9+9C, L)
        acc = jnp.dot(w_ref[...], patches, preferred_element_type=jnp.float32)
        return acc + bias_ref[...]                           # (C, L) + (C, 1) bias

    out = group_norm(x, g1_ref[...], b1_ref[...], relu=True)
    out = concat_conv(out, w1_ref, cb1_ref)
    out = group_norm(out, g2_ref[...], b2_ref[...], relu=True)
    out = concat_conv(out, w2_ref, cb2_ref)
    out = group_norm(out, g3_ref[...], b3_ref[...], relu=False)
    out_ref[0] = out


def _default_block_n(N, HW, max_lanes=4096):
    """Samples folded into the lane axis per grid step; keep >= 2 grid steps when N >= 2."""
    if N <= 1:
        return 1
    cap = max(1, max_lanes // HW)
    best = 1
    for d in range(1, N + 1):
        if N % d == 0 and d <= cap and N // d >= 2:
            best = d
    return best


def _flatten_conv_weight(w, C):
    # (C, C+1, 3, 3) OIHW -> (C, 9 + 9*C) bf16; columns = [t-channel weight for taps 0..8,
    # then for each tap the C input-channel weights] (matches the kernel's patch row order).
    w_r = jnp.transpose(w, (2, 3, 0, 1)).reshape(9, C, C + 1)       # (tap, out, in)
    wt = jnp.transpose(w_r[:, :, 0], (1, 0))                        # (C, 9)
    wx = jnp.transpose(w_r[:, :, 1:], (1, 0, 2)).reshape(C, 9 * C)  # (C, 9*C)
    return jnp.concatenate([wt, wx], axis=1).astype(jnp.bfloat16)


def _border_masks(H, W, block_n):
    # (9, block_n*H*W) f32: mask_k[p] = 1 iff the 3x3 tap k at position p stays inside the image.
    HW = H * W
    hh = np.arange(HW) // W
    ww = np.arange(HW) % W
    m = np.zeros((9, HW), np.float32)
    for k in range(9):
        dy, dx = k // 3 - 1, k % 3 - 1
        m[k] = ((hh + dy >= 0) & (hh + dy < H) & (ww + dx >= 0) & (ww + dx < W))
    return jnp.asarray(np.tile(m, (1, block_n)))


def odefunc_pallas(t, x, params, block_n=None):
    N, C, H, W = x.shape
    HW = H * W
    G = min(32, C)
    if block_n is None:
        block_n = _default_block_n(N, HW)
    else:
        block_n = max(1, min(int(block_n), N))
        while N % block_n:
            block_n -= 1
    NBLK = N // block_n
    L = block_n * HW

    # Host-side layout: fold block_n samples into the lane axis -> (NBLK, C, L).
    # (For block_n == 1 the transpose is a no-op, so no extra HBM pass in the default path.)
    x_l = (x.astype(jnp.float32)
            .reshape(NBLK, block_n, C, HW)
            .transpose(0, 2, 1, 3)
            .reshape(NBLK, C, L))

    masks = _border_masks(H, W, block_n)
    w1 = _flatten_conv_weight(params["w1"], C)
    w2 = _flatten_conv_weight(params["w2"], C)
    col = lambda v: v.reshape(C, 1).astype(jnp.float32)
    t_arr = jnp.asarray(t, jnp.float32).reshape(1)

    kernel = functools.partial(_odefunc_kernel, C=C, H=H, W=W, G=G, NB=block_n)
    KC = 9 * (C + 1)

    def full(shape):
        zeros = (0,) * len(shape)
        return pl.BlockSpec(shape, lambda b, _z=zeros: _z)

    in_specs = [
        pl.BlockSpec(memory_space=pltpu.MemorySpace.SMEM),   # t (scalar)
        pl.BlockSpec((1, C, L), lambda b: (b, 0, 0)),        # x block
        full((9, L)),                                        # border masks
        full((C, 1)), full((C, 1)),                          # gamma1, beta1
        full((C, KC)), full((C, 1)),                         # conv1: W_flat, bias
        full((C, 1)), full((C, 1)),                          # gamma2, beta2
        full((C, KC)), full((C, 1)),                         # conv2: W_flat, bias
        full((C, 1)), full((C, 1)),                          # gamma3, beta3
    ]

    out = pl.pallas_call(
        kernel,
        grid=(NBLK,),
        in_specs=in_specs,
        out_specs=pl.BlockSpec((1, C, L), lambda b: (b, 0, 0)),
        out_shape=jax.ShapeDtypeStruct((NBLK, C, L), jnp.float32),
        compiler_params=pltpu.CompilerParams(dimension_semantics=("parallel",)),
    )(t_arr, x_l, masks,
      col(params["g1"]), col(params["b1"]), w1, col(params["cb1"]),
      col(params["g2"]), col(params["b2"]), w2, col(params["cb2"]),
      col(params["g3"]), col(params["b3"]))

    return (out.reshape(NBLK, C, block_n, HW)
               .transpose(0, 2, 1, 3)
               .reshape(N, C, H, W))


def odefunc_reference(t, x, params):
    """Pure-JAX reference matching the PyTorch module (use_lyapunov_integration=False)."""
    C = x.shape[1]
    G = min(32, C)

    def gn(z, gamma, beta):
        n, c, h, w = z.shape
        zr = z.reshape(n, G, c // G, h, w)
        mean = jnp.mean(zr, axis=(2, 3, 4), keepdims=True)
        var = jnp.mean((zr - mean) ** 2, axis=(2, 3, 4), keepdims=True)
        zn = ((zr - mean) / jnp.sqrt(var + EPS)).reshape(n, c, h, w)
        return zn * gamma.reshape(1, c, 1, 1) + beta.reshape(1, c, 1, 1)

    def cconv(z, w, b):
        n, _, h, ww = z.shape
        tt = jnp.full((n, 1, h, ww), t, z.dtype)
        zz = jnp.concatenate([tt, z], axis=1)
        y = jax.lax.conv_general_dilated(
            zz, w, window_strides=(1, 1), padding=((1, 1), (1, 1)),
            dimension_numbers=("NCHW", "OIHW", "NCHW"),
            precision=jax.lax.Precision.HIGHEST)
        return y + b.reshape(1, -1, 1, 1)

    out = jax.nn.relu(gn(x, params["g1"], params["b1"]))
    out = cconv(out, params["w1"], params["cb1"])
    out = jax.nn.relu(gn(out, params["g2"], params["b2"]))
    out = cconv(out, params["w2"], params["cb2"])
    return gn(out, params["g3"], params["b3"])


def make_params(key, C):
    ks = jax.random.split(key, 8)
    fan_in = (C + 1) * 9
    bound = 1.0 / np.sqrt(fan_in)

    def conv_init(k):
        kw, kb = jax.random.split(k)
        w = jax.random.uniform(kw, (C, C + 1, 3, 3), jnp.float32, -bound, bound)
        b = jax.random.uniform(kb, (C,), jnp.float32, -bound, bound)
        return w, b

    w1, cb1 = conv_init(ks[0])
    w2, cb2 = conv_init(ks[1])
    return dict(
        w1=w1, cb1=cb1, w2=w2, cb2=cb2,
        g1=1.0 + 0.1 * jax.random.normal(ks[2], (C,), jnp.float32),
        b1=0.1 * jax.random.normal(ks[3], (C,), jnp.float32),
        g2=1.0 + 0.1 * jax.random.normal(ks[4], (C,), jnp.float32),
        b2=0.1 * jax.random.normal(ks[5], (C,), jnp.float32),
        g3=1.0 + 0.1 * jax.random.normal(ks[6], (C,), jnp.float32),
        b3=0.1 * jax.random.normal(ks[7], (C,), jnp.float32),
    )


if __name__ == "__main__":
    key = jax.random.PRNGKey(0)
    kx, kp = jax.random.split(key)
    N, C, H, W = 2, 4, 16, 16           # processed_dim = 4
    x = jax.random.normal(kx, (N, C, H, W), jnp.float32)
    t = 0.5
    params = make_params(kp, C)

    y_ref = odefunc_reference(t, x, params)

    # Default: >= 2 grid steps (one sample per step here) so both v7x cores get work.
    y1 = jax.block_until_ready(odefunc_pallas(t, x, params))
    # Batch fully folded into the lane axis (single wide grid step) to exercise lane-folding.
    y2 = jax.block_until_ready(odefunc_pallas(t, x, params, block_n=2))

    # Conv matmuls run with single-pass bf16 operands (f32 accumulate), hence 2e-2 tolerance
    # against the f32/HIGHEST reference; a real tap/mask/stat bug would be orders larger.
    np.testing.assert_allclose(np.asarray(y1), np.asarray(y_ref), rtol=2e-2, atol=2e-2)
    np.testing.assert_allclose(np.asarray(y2), np.asarray(y_ref), rtol=2e-2, atol=2e-2)
    print("KERNEL_OK")
</pallas_src>

<mosaic_0001>
module attributes {stable_mosaic.version = 11 : i64} {
  func.func @_odefunc_kernel(%arg0: i32, %arg1: memref<1xf32, #tpu.memory_space<smem>>, %arg2: memref<1x4x256xf32, #tpu.memory_space<vmem>>, %arg3: memref<9x256xf32, #tpu.memory_space<vmem>>, %arg4: memref<4x1xf32, #tpu.memory_space<vmem>>, %arg5: memref<4x1xf32, #tpu.memory_space<vmem>>, %arg6: memref<4x45xbf16, #tpu.memory_space<vmem>>, %arg7: memref<4x1xf32, #tpu.memory_space<vmem>>, %arg8: memref<4x1xf32, #tpu.memory_space<vmem>>, %arg9: memref<4x1xf32, #tpu.memory_space<vmem>>, %arg10: memref<4x45xbf16, #tpu.memory_space<vmem>>, %arg11: memref<4x1xf32, #tpu.memory_space<vmem>>, %arg12: memref<4x1xf32, #tpu.memory_space<vmem>>, %arg13: memref<4x1xf32, #tpu.memory_space<vmem>>, %arg14: memref<1x4x256xf32, #tpu.memory_space<vmem>>) attributes {dimension_semantics = [#tpu.dimension_semantics<parallel>], iteration_bounds = array<i64: 2>, scalar_prefetch = 0 : i64, scratch_operands = 0 : i64, tpu.core_type = #tpu.core_type<tc>, window_params = [{transform_indices = @transform_0, window_bounds = array<i64: 1>}, {transform_indices = @transform_1, window_bounds = array<i64: 1, 4, 256>}, {pipeline_mode = #tpu.pipeline_mode<synchronous>, transform_indices = @transform_2, window_bounds = array<i64: 9, 256>}, {pipeline_mode = #tpu.pipeline_mode<synchronous>, transform_indices = @transform_3, window_bounds = array<i64: 4, 1>}, {pipeline_mode = #tpu.pipeline_mode<synchronous>, transform_indices = @transform_4, window_bounds = array<i64: 4, 1>}, {pipeline_mode = #tpu.pipeline_mode<synchronous>, transform_indices = @transform_5, window_bounds = array<i64: 4, 45>}, {pipeline_mode = #tpu.pipeline_mode<synchronous>, transform_indices = @transform_6, window_bounds = array<i64: 4, 1>}, {pipeline_mode = #tpu.pipeline_mode<synchronous>, transform_indices = @transform_7, window_bounds = array<i64: 4, 1>}, {pipeline_mode = #tpu.pipeline_mode<synchronous>, transform_indices = @transform_8, window_bounds = array<i64: 4, 1>}, {pipeline_mode = #tpu.pipeline_mode<synchronous>, transform_indices = @transform_9, window_bounds = array<i64: 4, 45>}, {pipeline_mode = #tpu.pipeline_mode<synchronous>, transform_indices = @transform_10, window_bounds = array<i64: 4, 1>}, {pipeline_mode = #tpu.pipeline_mode<synchronous>, transform_indices = @transform_11, window_bounds = array<i64: 4, 1>}, {pipeline_mode = #tpu.pipeline_mode<synchronous>, transform_indices = @transform_12, window_bounds = array<i64: 4, 1>}, {transform_indices = @transform_13, window_bounds = array<i64: 1, 4, 256>}]} {
    %c0 = arith.constant 0 : index
    %0 = memref.load %arg1[%c0] : memref<1xf32, #tpu.memory_space<smem>>
    %c0_0 = arith.constant 0 : index
    %c0_1 = arith.constant 0 : index
    %c0_2 = arith.constant 0 : index
    %1 = vector.load %arg2[%c0_0, %c0_1, %c0_2] : memref<1x4x256xf32, #tpu.memory_space<vmem>>, vector<1x4x256xf32>
    %2 = vector.shape_cast %1 : vector<1x4x256xf32> to vector<4x256xf32>
    %c0_3 = arith.constant 0 : index
    %c0_4 = arith.constant 0 : index
    %3 = vector.load %arg3[%c0_3, %c0_4] : memref<9x256xf32, #tpu.memory_space<vmem>>, vector<9x256xf32>
    %4 = vector.broadcast %0 : f32 to vector<9x256xf32>
    %5 = arith.mulf %3, %4 : vector<9x256xf32>
    %c0_5 = arith.constant 0 : index
    %c0_6 = arith.constant 0 : index
    %6 = vector.load %arg4[%c0_5, %c0_6] : memref<4x1xf32, #tpu.memory_space<vmem>>, vector<4x1xf32>
    %c0_7 = arith.constant 0 : index
    %c0_8 = arith.constant 0 : index
    %7 = vector.load %arg5[%c0_7, %c0_8] : memref<4x1xf32, #tpu.memory_space<vmem>>, vector<4x1xf32>
    %cst = arith.constant dense<0.000000e+00> : vector<4xf32>
    %8 = vector.multi_reduction <add>, %2, %cst [1] : vector<4x256xf32> to vector<4xf32>
    %9 = vector.shape_cast %8 : vector<4xf32> to vector<4x1xf32>
    %10 = arith.mulf %2, %2 : vector<4x256xf32>
    %cst_9 = arith.constant dense<0.000000e+00> : vector<4xf32>
    %11 = vector.multi_reduction <add>, %10, %cst_9 [1] : vector<4x256xf32> to vector<4xf32>
    %12 = vector.shape_cast %11 : vector<4xf32> to vector<4x1xf32>
    %cst_10 = arith.constant 3.906250e-03 : f32
    %13 = vector.broadcast %cst_10 : f32 to vector<4x1xf32>
    %14 = arith.mulf %9, %13 : vector<4x1xf32>
    %cst_11 = arith.constant 3.906250e-03 : f32
    %15 = vector.broadcast %cst_11 : f32 to vector<4x1xf32>
    %16 = arith.mulf %12, %15 : vector<4x1xf32>
    %17 = arith.mulf %14, %14 : vector<4x1xf32>
    %18 = arith.subf %16, %17 : vector<4x1xf32>
    %cst_12 = arith.constant 0.000000e+00 : f32
    %19 = vector.broadcast %cst_12 : f32 to vector<4x1xf32>
    %20 = arith.maximumf %18, %19 : vector<4x1xf32>
    %cst_13 = arith.constant 9.99999974E-6 : f32
    %21 = vector.broadcast %cst_13 : f32 to vector<4x1xf32>
    %22 = arith.addf %20, %21 : vector<4x1xf32>
    %23 = math.rsqrt %22 : vector<4x1xf32>
    %24 = arith.mulf %6, %23 : vector<4x1xf32>
    %25 = arith.mulf %14, %24 : vector<4x1xf32>
    %26 = arith.subf %7, %25 : vector<4x1xf32>
    %27 = vector.broadcast %24 : vector<4x1xf32> to vector<4x256xf32>
    %28 = arith.mulf %2, %27 : vector<4x256xf32>
    %29 = vector.broadcast %26 : vector<4x1xf32> to vector<4x256xf32>
    %30 = arith.addf %28, %29 : vector<4x256xf32>
    %cst_14 = arith.constant 0.000000e+00 : f32
    %31 = vector.broadcast %cst_14 : f32 to vector<4x256xf32>
    %32 = arith.maximumf %30, %31 : vector<4x256xf32>
    %c17_i32 = arith.constant 17 : i32
    %33 = tpu.dynamic_rotate %32 by %c17_i32 dim 1 : vector<4x256xf32>, i32 -> vector<4x256xf32>
    %34 = vector.extract_strided_slice %3 {offsets = [0, 0], sizes = [1, 256], strides = [1, 1]} : vector<9x256xf32> to vector<1x256xf32>
    %35 = vector.broadcast %34 : vector<1x256xf32> to vector<4x256xf32>
    %36 = arith.mulf %33, %35 : vector<4x256xf32>
    %c16_i32 = arith.constant 16 : i32
    %37 = tpu.dynamic_rotate %32 by %c16_i32 dim 1 : vector<4x256xf32>, i32 -> vector<4x256xf32>
    %38 = vector.extract_strided_slice %3 {offsets = [1, 0], sizes = [1, 256], strides = [1, 1]} : vector<9x256xf32> to vector<1x256xf32>
    %39 = vector.broadcast %38 : vector<1x256xf32> to vector<4x256xf32>
    %40 = arith.mulf %37, %39 : vector<4x256xf32>
    %c15_i32 = arith.constant 15 : i32
    %41 = tpu.dynamic_rotate %32 by %c15_i32 dim 1 : vector<4x256xf32>, i32 -> vector<4x256xf32>
    %42 = vector.extract_strided_slice %3 {offsets = [2, 0], sizes = [1, 256], strides = [1, 1]} : vector<9x256xf32> to vector<1x256xf32>
    %43 = vector.broadcast %42 : vector<1x256xf32> to vector<4x256xf32>
    %44 = arith.mulf %41, %43 : vector<4x256xf32>
    %c1_i32 = arith.constant 1 : i32
    %45 = tpu.dynamic_rotate %32 by %c1_i32 dim 1 : vector<4x256xf32>, i32 -> vector<4x256xf32>
    %46 = vector.extract_strided_slice %3 {offsets = [3, 0], sizes = [1, 256], strides = [1, 1]} : vector<9x256xf32> to vector<1x256xf32>
    %47 = vector.broadcast %46 : vector<1x256xf32> to vector<4x256xf32>
    %48 = arith.mulf %45, %47 : vector<4x256xf32>
    %49 = vector.extract_strided_slice %3 {offsets = [4, 0], sizes = [1, 256], strides = [1, 1]} : vector<9x256xf32> to vector<1x256xf32>
    %50 = vector.broadcast %49 : vector<1x256xf32> to vector<4x256xf32>
    %51 = arith.mulf %32, %50 : vector<4x256xf32>
    %c255_i32 = arith.constant 255 : i32
    %52 = tpu.dynamic_rotate %32 by %c255_i32 dim 1 : vector<4x256xf32>, i32 -> vector<4x256xf32>
    %53 = vector.extract_strided_slice %3 {offsets = [5, 0], sizes = [1, 256], strides = [1, 1]} : vector<9x256xf32> to vector<1x256xf32>
    %54 = vector.broadcast %53 : vector<1x256xf32> to vector<4x256xf32>
    %55 = arith.mulf %52, %54 : vector<4x256xf32>
    %c241_i32 = arith.constant 241 : i32
    %56 = tpu.dynamic_rotate %32 by %c241_i32 dim 1 : vector<4x256xf32>, i32 -> vector<4x256xf32>
    %57 = vector.extract_strided_slice %3 {offsets = [6, 0], sizes = [1, 256], strides = [1, 1]} : vector<9x256xf32> to vector<1x256xf32>
    %58 = vector.broadcast %57 : vector<1x256xf32> to vector<4x256xf32>
    %59 = arith.mulf %56, %58 : vector<4x256xf32>
    %c240_i32 = arith.constant 240 : i32
    %60 = tpu.dynamic_rotate %32 by %c240_i32 dim 1 : vector<4x256xf32>, i32 -> vector<4x256xf32>
    %61 = vector.extract_strided_slice %3 {offsets = [7, 0], sizes = [1, 256], strides = [1, 1]} : vector<9x256xf32> to vector<1x256xf32>
    %62 = vector.broadcast %61 : vector<1x256xf32> to vector<4x256xf32>
    %63 = arith.mulf %60, %62 : vector<4x256xf32>
    %c239_i32 = arith.constant 239 : i32
    %64 = tpu.dynamic_rotate %32 by %c239_i32 dim 1 : vector<4x256xf32>, i32 -> vector<4x256xf32>
    %65 = vector.extract_strided_slice %3 {offsets = [8, 0], sizes = [1, 256], strides = [1, 1]} : vector<9x256xf32> to vector<1x256xf32>
    %66 = vector.broadcast %65 : vector<1x256xf32> to vector<4x256xf32>
    %67 = arith.mulf %64, %66 : vector<4x256xf32>
    %68 = tpu.concatenate %5, %36, %40, %44, %48, %51, %55, %59, %63, %67 in 0 : vector<9x256xf32>, vector<4x256xf32>, vector<4x256xf32>, vector<4x256xf32>, vector<4x256xf32>, vector<4x256xf32>, vector<4x256xf32>, vector<4x256xf32>, vector<4x256xf32>, vector<4x256xf32> -> vector<45x256xf32>
    %69 = arith.truncf %68 : vector<45x256xf32> to vector<45x256xbf16>
    %c0_15 = arith.constant 0 : index
    %c0_16 = arith.constant 0 : index
    %70 = vector.load %arg6[%c0_15, %c0_16] : memref<4x45xbf16, #tpu.memory_space<vmem>>, vector<4x45xbf16>
    %cst_17 = arith.constant dense<0.000000e+00> : vector<4x256xf32>
    %71 = tpu.matmul %70, %69, %cst_17 {dimension_numbers = #tpu.dot_dimension_numbers<[1], [0], [0], [1], [0, 0, 1, 1], [], []>} : vector<4x45xbf16>, vector<45x256xbf16>, vector<4x256xf32> -> vector<4x256xf32>
    %c0_18 = arith.constant 0 : index
    %c0_19 = arith.constant 0 : index
    %72 = vector.load %arg7[%c0_18, %c0_19] : memref<4x1xf32, #tpu.memory_space<vmem>>, vector<4x1xf32>
    %73 = vector.broadcast %72 : vector<4x1xf32> to vector<4x256xf32>
    %74 = arith.addf %71, %73 : vector<4x256xf32>
    %c0_20 = arith.constant 0 : index
    %c0_21 = arith.constant 0 : index
    %75 = vector.load %arg8[%c0_20, %c0_21] : memref<4x1xf32, #tpu.memory_space<vmem>>, vector<4x1xf32>
    %c0_22 = arith.constant 0 : index
    %c0_23 = arith.constant 0 : index
    %76 = vector.load %arg9[%c0_22, %c0_23] : memref<4x1xf32, #tpu.memory_space<vmem>>, vector<4x1xf32>
    %cst_24 = arith.constant dense<0.000000e+00> : vector<4xf32>
    %77 = vector.multi_reduction <add>, %74, %cst_24 [1] : vector<4x256xf32> to vector<4xf32>
    %78 = vector.shape_cast %77 : vector<4xf32> to vector<4x1xf32>
    %79 = arith.mulf %74, %74 : vector<4x256xf32>
    %cst_25 = arith.constant dense<0.000000e+00> : vector<4xf32>
    %80 = vector.multi_reduction <add>, %79, %cst_25 [1] : vector<4x256xf32> to vector<4xf32>
    %81 = vector.shape_cast %80 : vector<4xf32> to vector<4x1xf32>
    %cst_26 = arith.constant 3.906250e-03 : f32
    %82 = vector.broadcast %cst_26 : f32 to vector<4x1xf32>
    %83 = arith.mulf %78, %82 : vector<4x1xf32>
    %cst_27 = arith.constant 3.906250e-03 : f32
    %84 = vector.broadcast %cst_27 : f32 to vector<4x1xf32>
    %85 = arith.mulf %81, %84 : vector<4x1xf32>
    %86 = arith.mulf %83, %83 : vector<4x1xf32>
    %87 = arith.subf %85, %86 : vector<4x1xf32>
    %cst_28 = arith.constant 0.000000e+00 : f32
    %88 = vector.broadcast %cst_28 : f32 to vector<4x1xf32>
    %89 = arith.maximumf %87, %88 : vector<4x1xf32>
    %cst_29 = arith.constant 9.99999974E-6 : f32
    %90 = vector.broadcast %cst_29 : f32 to vector<4x1xf32>
    %91 = arith.addf %89, %90 : vector<4x1xf32>
    %92 = math.rsqrt %91 : vector<4x1xf32>
    %93 = arith.mulf %75, %92 : vector<4x1xf32>
    %94 = arith.mulf %83, %93 : vector<4x1xf32>
    %95 = arith.subf %76, %94 : vector<4x1xf32>
    %96 = vector.broadcast %93 : vector<4x1xf32> to vector<4x256xf32>
    %97 = arith.mulf %74, %96 : vector<4x256xf32>
    %98 = vector.broadcast %95 : vector<4x1xf32> to vector<4x256xf32>
    %99 = arith.addf %97, %98 : vector<4x256xf32>
    %cst_30 = arith.constant 0.000000e+00 : f32
    %100 = vector.broadcast %cst_30 : f32 to vector<4x256xf32>
    %101 = arith.maximumf %99, %100 : vector<4x256xf32>
    %c17_i32_31 = arith.constant 17 : i32
    %102 = tpu.dynamic_rotate %101 by %c17_i32_31 dim 1 : vector<4x256xf32>, i32 -> vector<4x256xf32>
    %103 = vector.extract_strided_slice %3 {offsets = [0, 0], sizes = [1, 256], strides = [1, 1]} : vector<9x256xf32> to vector<1x256xf32>
    %104 = vector.broadcast %103 : vector<1x256xf32> to vector<4x256xf32>
    %105 = arith.mulf %102, %104 : vector<4x256xf32>
    %c16_i32_32 = arith.constant 16 : i32
    %106 = tpu.dynamic_rotate %101 by %c16_i32_32 dim 1 : vector<4x256xf32>, i32 -> vector<4x256xf32>
    %107 = vector.extract_strided_slice %3 {offsets = [1, 0], sizes = [1, 256], strides = [1, 1]} : vector<9x256xf32> to vector<1x256xf32>
    %108 = vector.broadcast %107 : vector<1x256xf32> to vector<4x256xf32>
    %109 = arith.mulf %106, %108 : vector<4x256xf32>
    %c15_i32_33 = arith.constant 15 : i32
    %110 = tpu.dynamic_rotate %101 by %c15_i32_33 dim 1 : vector<4x256xf32>, i32 -> vector<4x256xf32>
    %111 = vector.extract_strided_slice %3 {offsets = [2, 0], sizes = [1, 256], strides = [1, 1]} : vector<9x256xf32> to vector<1x256xf32>
    %112 = vector.broadcast %111 : vector<1x256xf32> to vector<4x256xf32>
    %113 = arith.mulf %110, %112 : vector<4x256xf32>
    %c1_i32_34 = arith.constant 1 : i32
    %114 = tpu.dynamic_rotate %101 by %c1_i32_34 dim 1 : vector<4x256xf32>, i32 -> vector<4x256xf32>
    %115 = vector.extract_strided_slice %3 {offsets = [3, 0], sizes = [1, 256], strides = [1, 1]} : vector<9x256xf32> to vector<1x256xf32>
    %116 = vector.broadcast %115 : vector<1x256xf32> to vector<4x256xf32>
    %117 = arith.mulf %114, %116 : vector<4x256xf32>
    %118 = vector.extract_strided_slice %3 {offsets = [4, 0], sizes = [1, 256], strides = [1, 1]} : vector<9x256xf32> to vector<1x256xf32>
    %119 = vector.broadcast %118 : vector<1x256xf32> to vector<4x256xf32>
    %120 = arith.mulf %101, %119 : vector<4x256xf32>
    %c255_i32_35 = arith.constant 255 : i32
    %121 = tpu.dynamic_rotate %101 by %c255_i32_35 dim 1 : vector<4x256xf32>, i32 -> vector<4x256xf32>
    %122 = vector.extract_strided_slice %3 {offsets = [5, 0], sizes = [1, 256], strides = [1, 1]} : vector<9x256xf32> to vector<1x256xf32>
    %123 = vector.broadcast %122 : vector<1x256xf32> to vector<4x256xf32>
    %124 = arith.mulf %121, %123 : vector<4x256xf32>
    %c241_i32_36 = arith.constant 241 : i32
    %125 = tpu.dynamic_rotate %101 by %c241_i32_36 dim 1 : vector<4x256xf32>, i32 -> vector<4x256xf32>
    %126 = vector.extract_strided_slice %3 {offsets = [6, 0], sizes = [1, 256], strides = [1, 1]} : vector<9x256xf32> to vector<1x256xf32>
    %127 = vector.broadcast %126 : vector<1x256xf32> to vector<4x256xf32>
    %128 = arith.mulf %125, %127 : vector<4x256xf32>
    %c240_i32_37 = arith.constant 240 : i32
    %129 = tpu.dynamic_rotate %101 by %c240_i32_37 dim 1 : vector<4x256xf32>, i32 -> vector<4x256xf32>
    %130 = vector.extract_strided_slice %3 {offsets = [7, 0], sizes = [1, 256], strides = [1, 1]} : vector<9x256xf32> to vector<1x256xf32>
    %131 = vector.broadcast %130 : vector<1x256xf32> to vector<4x256xf32>
    %132 = arith.mulf %129, %131 : vector<4x256xf32>
    %c239_i32_38 = arith.constant 239 : i32
    %133 = tpu.dynamic_rotate %101 by %c239_i32_38 dim 1 : vector<4x256xf32>, i32 -> vector<4x256xf32>
    %134 = vector.extract_strided_slice %3 {offsets = [8, 0], sizes = [1, 256], strides = [1, 1]} : vector<9x256xf32> to vector<1x256xf32>
    %135 = vector.broadcast %134 : vector<1x256xf32> to vector<4x256xf32>
    %136 = arith.mulf %133, %135 : vector<4x256xf32>
    %137 = tpu.concatenate %5, %105, %109, %113, %117, %120, %124, %128, %132, %136 in 0 : vector<9x256xf32>, vector<4x256xf32>, vector<4x256xf32>, vector<4x256xf32>, vector<4x256xf32>, vector<4x256xf32>, vector<4x256xf32>, vector<4x256xf32>, vector<4x256xf32>, vector<4x256xf32> -> vector<45x256xf32>
    %138 = arith.truncf %137 : vector<45x256xf32> to vector<45x256xbf16>
    %c0_39 = arith.constant 0 : index
    %c0_40 = arith.constant 0 : index
    %139 = vector.load %arg10[%c0_39, %c0_40] : memref<4x45xbf16, #tpu.memory_space<vmem>>, vector<4x45xbf16>
    %cst_41 = arith.constant dense<0.000000e+00> : vector<4x256xf32>
    %140 = tpu.matmul %139, %138, %cst_41 {dimension_numbers = #tpu.dot_dimension_numbers<[1], [0], [0], [1], [0, 0, 1, 1], [], []>} : vector<4x45xbf16>, vector<45x256xbf16>, vector<4x256xf32> -> vector<4x256xf32>
    %c0_42 = arith.constant 0 : index
    %c0_43 = arith.constant 0 : index
    %141 = vector.load %arg11[%c0_42, %c0_43] : memref<4x1xf32, #tpu.memory_space<vmem>>, vector<4x1xf32>
    %142 = vector.broadcast %141 : vector<4x1xf32> to vector<4x256xf32>
    %143 = arith.addf %140, %142 : vector<4x256xf32>
    %c0_44 = arith.constant 0 : index
    %c0_45 = arith.constant 0 : index
    %144 = vector.load %arg12[%c0_44, %c0_45] : memref<4x1xf32, #tpu.memory_space<vmem>>, vector<4x1xf32>
    %c0_46 = arith.constant 0 : index
    %c0_47 = arith.constant 0 : index
    %145 = vector.load %arg13[%c0_46, %c0_47] : memref<4x1xf32, #tpu.memory_space<vmem>>, vector<4x1xf32>
    %cst_48 = arith.constant dense<0.000000e+00> : vector<4xf32>
    %146 = vector.multi_reduction <add>, %143, %cst_48 [1] : vector<4x256xf32> to vector<4xf32>
    %147 = vector.shape_cast %146 : vector<4xf32> to vector<4x1xf32>
    %148 = arith.mulf %143, %143 : vector<4x256xf32>
    %cst_49 = arith.constant dense<0.000000e+00> : vector<4xf32>
    %149 = vector.multi_reduction <add>, %148, %cst_49 [1] : vector<4x256xf32> to vector<4xf32>
    %150 = vector.shape_cast %149 : vector<4xf32> to vector<4x1xf32>
    %cst_50 = arith.constant 3.906250e-03 : f32
    %151 = vector.broadcast %cst_50 : f32 to vector<4x1xf32>
    %152 = arith.mulf %147, %151 : vector<4x1xf32>
    %cst_51 = arith.constant 3.906250e-03 : f32
    %153 = vector.broadcast %cst_51 : f32 to vector<4x1xf32>
    %154 = arith.mulf %150, %153 : vector<4x1xf32>
    %155 = arith.mulf %152, %152 : vector<4x1xf32>
    %156 = arith.subf %154, %155 : vector<4x1xf32>
    %cst_52 = arith.constant 0.000000e+00 : f32
    %157 = vector.broadcast %cst_52 : f32 to vector<4x1xf32>
    %158 = arith.maximumf %156, %157 : vector<4x1xf32>
    %cst_53 = arith.constant 9.99999974E-6 : f32
    %159 = vector.broadcast %cst_53 : f32 to vector<4x1xf32>
    %160 = arith.addf %158, %159 : vector<4x1xf32>
    %161 = math.rsqrt %160 : vector<4x1xf32>
    %162 = arith.mulf %144, %161 : vector<4x1xf32>
    %163 = arith.mulf %152, %162 : vector<4x1xf32>
    %164 = arith.subf %145, %163 : vector<4x1xf32>
    %165 = vector.broadcast %162 : vector<4x1xf32> to vector<4x256xf32>
    %166 = arith.mulf %143, %165 : vector<4x256xf32>
    %167 = vector.broadcast %164 : vector<4x1xf32> to vector<4x256xf32>
    %168 = arith.addf %166, %167 : vector<4x256xf32>
    %c0_54 = arith.constant 0 : index
    %c0_55 = arith.constant 0 : index
    %c0_56 = arith.constant 0 : index
    %169 = vector.load %arg14[%c0_54, %c0_55, %c0_56] : memref<1x4x256xf32, #tpu.memory_space<vmem>>, vector<1x4x256xf32>
    %170 = vector.shape_cast %169 : vector<1x4x256xf32> to vector<4x256xf32>
    %171 = vector.shape_cast %168 : vector<4x256xf32> to vector<1x4x256xf32>
    tpu.vector_store %arg14[%c0_54, %c0_55, %c0_56], %171 {strides = array<i32>} : memref<1x4x256xf32, #tpu.memory_space<vmem>>, vector<1x4x256xf32>,
    return
  }
  func.func @transform_0(%arg0: i32) -> i32 {
    %c0_i32 = arith.constant 0 : i32
    %c0_i32_0 = arith.constant 0 : i32
    return %c0_i32 : i32
  }
  func.func @transform_1(%arg0: i32) -> (i32, i32, i32) {
    %c0_i32 = arith.constant 0 : i32
    %c0_i32_0 = arith.constant 0 : i32
    %c0_i32_1 = arith.constant 0 : i32
    return %arg0, %c0_i32, %c0_i32_0 : i32, i32, i32
  }
  func.func @transform_2(%arg0: i32) -> (i32, i32) {
    %c0_i32 = arith.constant 0 : i32
    %c0_i32_0 = arith.constant 0 : i32
    %c0_i32_1 = arith.constant 0 : i32
    return %c0_i32, %c0_i32_0 : i32, i32
  }
  func.func @transform_3(%arg0: i32) -> (i32, i32) {
    %c0_i32 = arith.constant 0 : i32
    %c0_i32_0 = arith.constant 0 : i32
    %c0_i32_1 = arith.constant 0 : i32
    return %c0_i32, %c0_i32_0 : i32, i32
  }
  func.func @transform_4(%arg0: i32) -> (i32, i32) {
    %c0_i32 = arith.constant 0 : i32
    %c0_i32_0 = arith.constant 0 : i32
    %c0_i32_1 = arith.constant 0 : i32
    return %c0_i32, %c0_i32_0 : i32, i32
  }
  func.func @transform_5(%arg0: i32) -> (i32, i32) {
    %c0_i32 = arith.constant 0 : i32
    %c0_i32_0 = arith.constant 0 : i32
    %c0_i32_1 = arith.constant 0 : i32
    return %c0_i32, %c0_i32_0 : i32, i32
  }
  func.func @transform_6(%arg0: i32) -> (i32, i32) {
    %c0_i32 = arith.constant 0 : i32
    %c0_i32_0 = arith.constant 0 : i32
    %c0_i32_1 = arith.constant 0 : i32
    return %c0_i32, %c0_i32_0 : i32, i32
  }
  func.func @transform_7(%arg0: i32) -> (i32, i32) {
    %c0_i32 = arith.constant 0 : i32
    %c0_i32_0 = arith.constant 0 : i32
    %c0_i32_1 = arith.constant 0 : i32
    return %c0_i32, %c0_i32_0 : i32, i32
  }
  func.func @transform_8(%arg0: i32) -> (i32, i32) {
    %c0_i32 = arith.constant 0 : i32
    %c0_i32_0 = arith.constant 0 : i32
    %c0_i32_1 = arith.constant 0 : i32
    return %c0_i32, %c0_i32_0 : i32, i32
  }
  func.func @transform_9(%arg0: i32) -> (i32, i32) {
    %c0_i32 = arith.constant 0 : i32
    %c0_i32_0 = arith.constant 0 : i32
    %c0_i32_1 = arith.constant 0 : i32
    return %c0_i32, %c0_i32_0 : i32, i32
  }
  func.func @transform_10(%arg0: i32) -> (i32, i32) {
    %c0_i32 = arith.constant 0 : i32
    %c0_i32_0 = arith.constant 0 : i32
    %c0_i32_1 = arith.constant 0 : i32
    return %c0_i32, %c0_i32_0 : i32, i32
  }
  func.func @transform_11(%arg0: i32) -> (i32, i32) {
    %c0_i32 = arith.constant 0 : i32
    %c0_i32_0 = arith.constant 0 : i32
    %c0_i32_1 = arith.constant 0 : i32
    return %c0_i32, %c0_i32_0 : i32, i32
  }
  func.func @transform_12(%arg0: i32) -> (i32, i32) {
    %c0_i32 = arith.constant 0 : i32
    %c0_i32_0 = arith.constant 0 : i32
    %c0_i32_1 = arith.constant 0 : i32
    return %c0_i32, %c0_i32_0 : i32, i32
  }
  func.func @transform_13(%arg0: i32) -> (i32, i32, i32) {
    %c0_i32 = arith.constant 0 : i32
    %c0_i32_0 = arith.constant 0 : i32
    %c0_i32_1 = arith.constant 0 : i32
    return %arg0, %c0_i32, %c0_i32_0 : i32, i32, i32
  }
}

</mosaic_0001>

<bundles_post_ra>
// kernel: tpu_custom_call.1
= control target key start
LH: loop header
LB: loop body
LE: loop exit
PB: predicated region body
PF: predicated region fallthrough
CT: control target
= control target key end

     0   :  { %s1969_s0 = inlined_call_operand.<no memory space> [shape: f32[1], index: 0, kind: input, shape index: {}]   ;;  %s1970_s1 = inlined_call_operand.hbm [shape: f32[2,4,256], index: 1, kind: input, shape index: {}]   ;;  %s1971_s2 = inlined_call_operand.vmem [shape: f32[9,256], index: 2, kind: input, shape index: {}]   ;;  %s1972_s3 = inlined_call_operand.vmem [shape: f32[4,1], index: 3, kind: input, shape index: {}]   ;;  %s1973_s4 = inlined_call_operand.vmem [shape: f32[4,1], index: 4, kind: input, shape index: {}]   ;;  %s1974_s5 = inlined_call_operand.vmem [shape: bf16[4,45], index: 5, kind: input, shape index: {}]   ;;  %s1975_s6 = inlined_call_operand.vmem [shape: f32[4,1], index: 6, kind: input, shape index: {}]   ;;  %s1976_s7 = inlined_call_operand.vmem [shape: f32[4,1], index: 7, kind: input, shape index: {}]   ;;  %s1977_s8 = inlined_call_operand.vmem [shape: f32[4,1], index: 8, kind: input, shape index: {}]   ;;  %s1978_s9 = inlined_call_operand.vmem [shape: bf16[4,45], index: 9, kind: input, shape index: {}]   ;;  %s1979_s10 = inlined_call_operand.vmem [shape: f32[4,1], index: 10, kind: input, shape index: {}]   ;;  %s1980_s11 = inlined_call_operand.vmem [shape: f32[4,1], index: 11, kind: input, shape index: {}]   ;;  %s1981_s12 = inlined_call_operand.vmem [shape: f32[4,1], index: 12, kind: input, shape index: {}]   ;;  %s1982_s13 = inlined_call_operand.hbm [shape: f32[2,4,256], index: 13, kind: output, shape index: {}]  }
   0x1   :  { %18 = sst [smem:[#allocation2]] %s1969_s0 }
   0x2   :  { %19 = vsyncpa [#allocation4], 0 }
   0x3   :  { %21 = vsyncpa [#allocation4 + $0x1], 0 }
   0x4   :  { %22 = vsyncpa [#allocation5], 0 }
   0x5   :  { %24 = vsyncpa [#allocation5 + $0x1], 0  ;;  %s1460_s27 = smov 0   ;;  %s1462_s28 = smov 0  }
   0x6   :  { %s1464_s29 = smov 0   ;;  %s1466_s30 = smov 0  }
   0x7 LB: > { %1994 = sst [smem:[#allocation9_spill]] %s1368_s29  ;;  %s1481_s0 = sadd.s32 4294967295, %s1372_s30   ;;  %s1372_s30 = sphi %s1466_s30, %s2011_s30   ;;  %s1368_s29 = sphi %s1464_s29, %s2013_s29   ;;  %s1364_s28 = sphi %s1462_s28, %s2015_s28   ;;  %s1360_s27 = sphi %s1460_s27, %s2014_s27  }
   0x8   : > { %s1192_s14 = sadd.s32 4294967294, %s1372_s30   ;;  %s1485_s15 = sadd.s32 1, %s1372_s30  }
   0x9   : > { %1995 = sst [smem:[#allocation10_spill]] %s1485_s15  ;;  %s58_s16 = sadd.s32 1, %s1368_s29 }
   0xa   : > { %s55_s17 = ssub.s32 %s1372_s30, %s1485_s15  ;;  %p65_p0 = scmp.ne.s32.totalorder %s1368_s29, %s1364_s28 }
   0xb   : > { %p56_p1 = scmp.eq.s32.totalorder %s55_s17, 0  ;;  %p66_p2 = scmp.eq.s32.totalorder %s1372_s30, 0 }
   0xc   : > { %p71_p3 = scmp.ne.s32.totalorder %s1364_s28, %s1360_s27  ;;  %p72_p4 = scmp.eq.s32.totalorder %s1481_s0, 0 }
   0xd   : > { %s1497_s18 = scalar_select %p56_p1, %s1368_s29, %s58_s16  }
   0xe   : > { %p1499_p5 = por %p66_p2, %p65_p0  ;;  %p1503_p6 = por %p72_p4, %p71_p3 }
   0xf   : > { %1996 = sst [smem:[#allocation11_spill]] %s1497_s18  ;;  %p326_p7 = scmp.eq.s32.totalorder %s1481_s0, 1 }
  0x10   : > { %p332_p8 = scmp.eq.s32.totalorder %s1192_s14, 1  ;;  %p1222_p10 = scmp.lt.s32.totalorder %s1372_s30, 2 }
  0x11   : > { %p1510_p11 = por %p326_p7, %p65_p0  ;;  %s388_s23 = sand.u32 1, %s1368_s29  }
  0x12   : > { %p1514_p12 = por %p332_p8, %p71_p3  ;;  %s1208_s24 = sshll.u32 %s1372_s30, 7 }
  0x13   : > { %s1999_s21 = scalar_select %p1510_p11, 1, 0 }
  0x14   : > { %s2000_s22 = scalar_select %p1514_p12, 1, 0 }
  0x15   : > { %s1195_s25 = sshll.u32 %s388_s23, 3  ;;  %s1523_s17 = scalar_lea.hbm %s1970_s1, %s1208_s24 }
  0x16   : > { %s392_s14 = scalar_lea.vmem [#allocation3], %s1195_s25  ;;  %p1527_p13 = pnand %p1222_p10, %p1499_p5 }
  0x17   : > { %s400_s18 = sshll.u32 %s392_s14, 4  ;;  %s389_s26 = scalar_lea.sflag [#allocation4], %s388_s23  ;;  %s1531_s18 = int_to_ptr.vmem [resolvable:$true] %s400_s18 }
  0x18   : > { %s1276_s24 = scalar_lea.hbm %s1523_s17, 128  ;;  %p1278_p3 = pneg %p1527_p13 }
  0x19   : > { %p1277_p2 = scmp.ne.s32.totalorder %s1523_s17, %s1276_s24  ;;  %s1281_s16 = scalar_lea.hbm %s1970_s1, 256 }
  0x1a   : > { %p1282_p5 = scmp.lt.u32.totalorder %s1523_s17, %s1970_s1  ;;  %p1283_p8 = scmp.lt.u32.totalorder %s1281_s16, %s1276_s24 }
  0x1b   : > { %p1279_p4 = pnand %p1278_p3, %p1277_p2  ;;  %p1285_p9 = scmp.lt.u32.totalorder %s1276_s24, %s1523_s17 }
  0x1c   : > { %p1284_p10 = por %p1283_p8, %p1282_p5 }
  0x1d   : > { %p1280_p7 = pneg %p1279_p4 }
  0x1e   : > { %p1286_p0 = por %p1285_p9, %p1284_p10 }
  0x20   : > { %p1287_p1 = pnand %p1286_p0, %p1280_p7 }
  0x22   : > { %1290 = shalt.err (!%p1287_p1)
}
  0x23   : > { %s1291_s23 = scalar_lea.vmem %s1531_s18, 128  ;;  %s1374_s19 = smov [#allocation3]  }
  0x24   : > { %p1292_p2 = scmp.ne.s32.totalorder %s1531_s18, %s1291_s23  ;;  %s1296_s25 = sshll.u32 %s1374_s19, 4  ;;  %s1297_s25 = int_to_ptr.vmem [resolvable:$false] %s1296_s25 }
  0x25   : > { %s1298_s29 = scalar_lea.vmem %s1297_s25, 256  ;;  %p1299_p11 = scmp.lt.s32.totalorder %s1531_s18, %s1297_s25 }
  0x26   : > { %p1294_p4 = pnand %p1292_p2, %p1278_p3  ;;  %p1300_p5 = scmp.lt.s32.totalorder %s1298_s29, %s1291_s23 }
  0x28   : > { %p1295_p12 = pneg %p1294_p4  ;;  %p1301_p8 = por %p1300_p5, %p1299_p11 }
  0x2a   : > { %p1302_p9 = pnand %p1301_p8, %p1295_p12 }
  0x2c   : > { %1305 = shalt.err (!%p1302_p9)
}
  0x2d   : > { %1217 = dma.hbm_to_vmem [thread:$0]  (!%p1527_p13), %s1523_s17, 128, %s1531_s18, %s389_s26  }
  0x2e   : > { %p2002_p0 = scmp.lt.s32.totalorder %s1372_s30, 3  ;;  %p2003_p1 = scmp.ge.s32.totalorder %s1372_s30, 1 }
  0x30   : > { %p406_p3 = pnand %p2003_p1, %p2002_p0 }
  0x31   : > { %s1565_s24 = sand.u32 (!%p406_p3), 1, %s1364_s28  }
  0x32   : > { %409 = sbr.rel (%p406_p3) target bundleno = 1751 (0x6d7), region = 72  ;;  %s1987_s16 = sshll.u32 (!%p406_p3), %s1565_s24, 3 }
  0x33   : > { %s412_s14 = scalar_lea.sflag (!%p406_p3), [#allocation4], %s1565_s24  ;;  %s415_s15 = scalar_lea.vmem (!%p406_p3), [#allocation3], %s1987_s16 }
  0x39   : > { %1351 = dma.done.wait (%p1503_p6), %s412_s14, 128  }
  0x3a   : > { %1353 = vsyncadd (%p1503_p6), %s412_s14, 4294967168  ;;  %vm475_vm0 = vcmask 1043456   ;;  %v460_v0 = vld [vmem:[%s415_s15] sm:$0xff]  ;;  %v1375_v10 = vmov 0   ;;  %v1376_v25 = vmov 839922192   ;;  %v507_v27 = vlaneseq }
  0x3b   : > { %v473_v1 = vcombine.high %v460_v0, %v460_v0  ;;  %v476_v2 = vsel %vm475_vm0, %v460_v0, 0.0  ;;  %v481_v3 = vmul.f32 %v460_v0, %v460_v0  ;;  %1267 = vset.pattern.permute.xlu1 %v1375_v10  ;;  %814 = vmatprep.mubr.bf16.mxu0 %v1375_v10  ;;  %v470_v19 = vld [vmem:[%s1972_s3] sm:$0xf]  ;;  %v505_v26 = vunpack.c.l.s4 %v1376_v25  ;;  %s1992_s23 = smov 16   ;;  %s1378_s19 = smov 17   ;;  %v462_v43 = vld [vmem:[%s1971_s2 + $0x8] sm:$0xff] }
  0x3c   : > { %1268 = vset.pattern.permute.xlu0 %v1375_v10  ;;  %1055 = vmatprep.mubr.bf16.mxu1 %v1375_v10  ;;  %v471_v22 = vld [vmem:[%s1973_s4] sm:$0xf]  ;;  %v1585_v29 = vshrl.u32 %v507_v27, 7  ;;  %s1379_s25 = smov 15   ;;  %s1380_s29 = smov 1   ;;  %v1629_v52 = vand.u32 127, %v507_v27 }
  0x3d   : > { %v477_v4 = vsel %vm475_vm0, %v473_v1, 0.0  ;;  %v483_v5 = vcombine.high %v481_v3, %v481_v3  ;;  %v485_v6 = vsel %vm475_vm0, %v481_v3, 0.0  ;;  %v506_v28 = vunpack.c.0.s8 %v505_v26  ;;  %s1381_s14 = smov 127   ;;  %s1990_s15 = smov 113   ;;  %v762_v39 = vld [vmem:[%s1975_s6] sm:$0xf] }
  0x3e   : > { %v478_v7 = vadd.f32 %v477_v4, %v476_v2  ;;  %s1988_s18 = smov 112   ;;  %s1384_s20 = smov 111   ;;  %v602_v40 = vsub.s32 4, %v1585_v29  ;;  %v1613_v42 = vld [vmem:[%s1971_s2] sm:$0xff]  ;;  %v592_v53 = vsub.s32 3, %v1585_v29  ;;  %v622_v55 = vsub.s32 5, %v1585_v29 }
  0x3f   : > { %v486_v8 = vsel %vm475_vm0, %v483_v5, 0.0  ;;  %v509_v30 = vsub.s32 %v506_v28, %v1585_v29  ;;  %s459_s16 = sld [smem:[#allocation2]]  ;;  %v639_v56 = vsub.s32 6, %v1585_v29  ;;  %v656_v58 = vsub.s32 7, %v1585_v29  ;;  %s2004_s26 = smov 16  }
  0x40   : > { %479 = vadd.xlane.f32.xlu0 %v478_v7  ;;  %v487_v9 = vadd.f32 %v486_v8, %v485_v6  ;;  %v1619_v45 = vrot.slane %v1613_v42, %v602_v40  ;;  %v1621_v46 = vrot.slane %v462_v43, %v602_v40  ;;  %vm587_vm1 = vcmp.lt.s32.totalorder %v1629_v52, 1  ;;  %v463_v7 = vld [vmem:[%s1971_s2 + $0x10] sm:$0x1]  ;;  %v464_v8 = vld [vmem:[%s1971_s2 + $0x18] sm:$0x1]  ;;  %p2008_p11 = scmp.ne.s32.totalorder %s1999_s21, 0 }
  0x41   : > { %v1641_v60 = vrot.slane %v1613_v42, %v592_v53  ;;  %v1643_v61 = vrot.slane %v462_v43, %v592_v53  ;;  %vm617_vm2 = vcmp.lt.s32.totalorder %v1629_v52, 127  ;;  %v1647_v63 = vrot.slane %v1613_v42, %v622_v55 }
  0x42   : > { %v610_v48 = vcombine.low %v1619_v45, %v1621_v46  ;;  %vm634_vm3 = vcmp.lt.s32.totalorder %v1629_v52, 113  ;;  %v541_v1 = vsub.s32 0, %v1585_v29  ;;  %v1654_v2 = vrot.slane %v1613_v42, %v639_v56 }
  0x43   : > { %v1656_v3 = vrot.slane %v462_v43, %v639_v56  ;;  %v558_v4 = vsub.s32 1, %v1585_v29  ;;  %vm651_vm4 = vcmp.lt.s32.totalorder %v1629_v52, 112  ;;  %v1662_v6 = vrot.slane %v1613_v42, %v656_v58 }
  0x44   : > { %488 = vadd.xlane.f32.xlu0 %v487_v9  ;;  %vm735_vm5 = vcmask 1040384   ;;  %vm536_vm6 = vcmp.lt.s32.totalorder %v1629_v52, 17  ;;  %vm553_vm7 = vcmp.lt.s32.totalorder %v1629_v52, 16  ;;  %vm772_vm8 = vcmask 1045504  }
  0x45   : > { %v465_v9 = vstv %s459_s16  ;;  %vm570_vm9 = vcmp.lt.s32.totalorder %v1629_v52, 15  ;;  %vm738_vm10 = vcmask 1044480   ;;  %vm668_vm11 = vcmp.lt.s32.totalorder %v1629_v52, 111  ;;  %s2005_s16 = smov 113  }
  0x46   : > { %v1705_v28 = vmul.f32 %v465_v9, %v462_v43  ;;  %vm773_vm12 = vcmask 1046528   ;;  %vm768_vm13 = vcmask 367616  }
  0xcd   : > { %v480_v11 = vpop.xlane.xlu0 %479 }
  0xce   : > { %v490_v12 = vmul.f32 0.00390625, %v480_v11 }
  0xd0   : > { %v492_v14 = vmul.f32 %v490_v12, %v490_v12 }
  0xd1   : > { %v489_v13 = vpop.xlane.xlu0 %488 }
  0xd2   : > { %v491_v15 = vmul.f32 0.00390625, %v489_v13  ;;  %v1674_v13 = vrot.slane %v462_v43, %v656_v58 }
  0xd4   : > { %v493_v16 = vsub.f32 %v491_v15, %v492_v14  ;;  %v575_v15 = vsub.s32 2, %v1585_v29 }
  0xd6   : > { %v494_v17 = vmax.f32 %v493_v16, 0.0  ;;  %v1701_v26 = vrot.slane %v1613_v42, %v575_v15  ;;  %v1703_v27 = vrot.slane %v462_v43, %v575_v15 }
  0xd8   : > { %v495_v18 = vadd.f32 1e-05, %v494_v17  ;;  %v1679_v17 = vrot.slane %v1613_v42, %v541_v1 }
  0xda   : > { %1270 = vrsqrt.f32 %v495_v18  ;;  %v1681_v18 = vrot.slane %v462_v43, %v541_v1 }
  0xe4   : > { %v1271_v20 = vpop.eup %1270 }
  0xe5   : > { %v497_v21 = vmul.f32 %v1271_v20, %v470_v19  ;;  %v1685_v19 = vrot.slane %v1613_v42, %v558_v4  ;;  %v1687_v20 = vrot.slane %v462_v43, %v558_v4 }
  0xe7   : > { %502 = vperm.xlu1 %1267, %v497_v21   ;;  %v498_v23 = vmul.f32 %v497_v21, %v490_v12  ;;  %v1689_v21 = vmul.f32 %v465_v9, %v464_v8 }
  0xe9   : > { %v499_v24 = vsub.f32 %v471_v22, %v498_v23  ;;  %v1691_v22 = vmul.f32 %v465_v9, %v463_v7 }
  0xeb   : > { %515 = vperm.xlu1 %1267, %v499_v24  }
 0x166   : > { %v503_v31 = vpop.permute.xlu1 %502 }
 0x167   : > { %v510_v32 = vrot.slane %v503_v31, %v509_v30  ;;  %v1711_v31 = vrot.slane %v463_v7, %v541_v1 }
 0x169   : > { %v512_v34 = vmul.f32 %v510_v32, %v460_v0  ;;  %v1649_v0 = vrot.slane %v462_v43, %v622_v55  ;;  %v1714_v32 = vmul.f32 %v465_v9, %v1613_v42 }
 0x16a   : > { %v516_v33 = vpop.permute.xlu1 %515 }
 0x16b   : > { %v523_v35 = vrot.slane %v516_v33, %v509_v30 }
 0x16d   : > { %v525_v36 = vadd.f32 %v523_v35, %v512_v34  ;;  %v1719_v35 = vrot.slane %v464_v8, %v541_v1 }
 0x16f   : > { %v526_v37 = vmax.f32 %v525_v36, 0.0  ;;  %v1385_v36 = vmov 65535  }
 0x171   : > { %549 = vrot.lane.b32.xlu1 %v526_v37, %s1992_s23  ;;  %530 = vrot.lane.b32.xlu0 %v526_v37, %s1378_s19  ;;  %v528_v38 = vcombine.high %v526_v37, %v526_v37  ;;  %v1627_v51 = vmul.f32 %v610_v48, %v526_v37 }
 0x173   : > { %v706_v59 = vcombine.high %v1627_v51, %v1627_v51  ;;  %v707_v5 = vrot.slane %v1627_v51, 7 }
 0x175   : > { %566 = vrot.lane.b32.xlu1 %v526_v37, %s1379_s25  ;;  %585 = vrot.lane.b32.xlu0 %v528_v38, %s1380_s29  ;;  %v708_v10 = vrot.slane %v706_v59, 7 }
 0x179   : > { %583 = vrot.lane.b32.xlu1 %v526_v37, %s1380_s29  ;;  %615 = vrot.lane.b32.xlu0 %v528_v38, %s1381_s14 }
 0x17d   : > { %613 = vrot.lane.b32.xlu1 %v526_v37, %s1381_s14  ;;  %632 = vrot.lane.b32.xlu0 %v528_v38, %s1990_s15 }
 0x181   : > { %630 = vrot.lane.b32.xlu1 %v526_v37, %s1990_s15  ;;  %649 = vrot.lane.b32.xlu0 %v528_v38, %s1988_s18 }
 0x185   : > { %647 = vrot.lane.b32.xlu1 %v526_v37, %s1988_s18  ;;  %666 = vrot.lane.b32.xlu0 %v528_v38, %s1384_s20 }
 0x189   : > { %532 = vrot.lane.b32.xlu1 %v528_v38, %s1378_s19 }
 0x18d   : > { %551 = vrot.lane.b32.xlu1 %v528_v38, %s1992_s23  ;;  %s2006_s23 = smov 112  }
 0x191   : > { %568 = vrot.lane.b32.xlu1 %v528_v38, %s1379_s25 }
 0x195   : > { %664 = vrot.lane.b32.xlu1 %v526_v37, %s1384_s20  ;;  %v1722_v37 = vsel %vm772_vm8, 4294967295, %v1385_v36 }
 0x199   : > { %765 = vperm.xlu1 %1267, %v762_v39  }
 0x1e3   : > { %v1608_v41 = vpop.permute.xlu1 %549  ;;  %v531_v44 = vpop.permute.xlu0 %530 }
 0x1e7   : > { %v1623_v47 = vpop.permute.xlu1 %566  ;;  %v586_v50 = vpop.permute.xlu0 %585 }
 0x1eb   : > { %v584_v49 = vpop.permute.xlu1 %583  ;;  %v616_v57 = vpop.permute.xlu0 %615 }
 0x1ec   : > { %v588_v11 = vsel %vm587_vm1, %v584_v49, %v586_v50  ;;  %v589_v12 = vsel %vm587_vm1, %v586_v50, %v584_v49 }
 0x1ed   : > { %v1694_v23 = vmul.f32 %v1641_v60, %v589_v12  ;;  %v1697_v24 = vmul.f32 %v1643_v61, %v588_v11 }
 0x1ef   : > { %v1632_v54 = vpop.permute.xlu1 %613  ;;  %v633_v16 = vpop.permute.xlu0 %632  ;;  %v701_v38 = vrot.slane %v1694_v23, 3  ;;  %v702_v39 = vrot.slane %v1697_v24, 3 }
 0x1f0   : > { %v618_v40 = vsel %vm617_vm2, %v1632_v54, %v616_v57  ;;  %v619_v42 = vsel %vm617_vm2, %v616_v57, %v1632_v54 }
 0x1f1   : > { %v628_v58 = vmul.f32 %v1647_v63, %v618_v40  ;;  %v629_v59 = vmul.f32 %v1649_v0, %v619_v42  ;;  %v746_v8 = vsel %vm735_vm5, %v702_v39, %v708_v10  ;;  %v745_v9 = vsel %vm735_vm5, %v701_v38, %v707_v5 }
 0x1f3   : > { %v631_v62 = vpop.permute.xlu1 %630  ;;  %v650_v43 = vpop.permute.xlu0 %649 }
 0x1f4   : > { %v636_v48 = vsel %vm634_vm3, %v633_v16, %v631_v62 }
 0x1f5   : > { %v646_v7 = vmul.f32 %v1656_v3, %v636_v48 }
 0x1f7   : > { %v648_v14 = vpop.permute.xlu1 %647  ;;  %v720_v40 = vrot.slane %v646_v7, 7  ;;  %v667_v42 = vpop.permute.xlu0 %666 }
 0x1f8   : > { %v652_v49 = vsel %vm651_vm4, %v648_v14, %v650_v43  ;;  %v653_v50 = vsel %vm651_vm4, %v650_v43, %v648_v14 }
 0x1f9   : > { %v663_v11 = vmul.f32 %v1674_v13, %v653_v50 }
 0x1fb   : > { %v533_v25 = vpop.permute.xlu1 %532  ;;  %v726_v50 = vrot.slane %v663_v11, 3 }
 0x1fc   : > { %v537_v29 = vsel %vm536_vm6, %v531_v44, %v533_v25  ;;  %v538_v30 = vsel %vm536_vm6, %v533_v25, %v531_v44  ;;  %v635_v44 = vsel %vm634_vm3, %v631_v62, %v633_v16 }
 0x1fd   : > { %v547_v33 = vmul.f32 %v1679_v17, %v538_v30  ;;  %v548_v34 = vmul.f32 %v1681_v18, %v537_v29  ;;  %v645_v4 = vmul.f32 %v1654_v2, %v635_v44  ;;  %v713_v30 = vrot.slane %v628_v58, 3 }
 0x1ff   : > { %v552_v53 = vpop.permute.xlu1 %551  ;;  %v683_v55 = vrot.slane %v547_v33, 7  ;;  %v684_v56 = vrot.slane %v548_v34, 7  ;;  %v714_v33 = vrot.slane %v629_v59, 3  ;;  %v719_v36 = vrot.slane %v645_v4, 7 }
 0x200   : > { %v554_v54 = vsel %vm553_vm7, %v1608_v41, %v552_v53  ;;  %v555_v57 = vsel %vm553_vm7, %v552_v53, %v1608_v41  ;;  %v662_v41 = vmul.f32 %v1662_v6, %v652_v49  ;;  %v747_v4 = vsel %vm738_vm10, %v745_v9, %v713_v30 }
 0x201   : > { %v564_v62 = vmul.f32 %v1685_v19, %v555_v57  ;;  %v565_v1 = vmul.f32 %v1687_v20, %v554_v54  ;;  %v737_v51 = vsel %vm735_vm5, %v1689_v21, %v684_v56  ;;  %v736_v5 = vsel %vm735_vm5, %v1691_v22, %v683_v55 }
 0x202   : > { %v725_v49 = vrot.slane %v662_v41, 3 }
 0x203   : > { %v689_v12 = vrot.slane %v564_v62, 3  ;;  %v690_v14 = vrot.slane %v565_v1, 3  ;;  %v569_v15 = vpop.permute.xlu1 %568  ;;  %v748_v62 = vsel %vm738_vm10, %v746_v8, %v714_v33 }
 0x204   : > { %v571_v16 = vsel %vm570_vm9, %v1623_v47, %v569_v15  ;;  %v572_v23 = vsel %vm570_vm9, %v569_v15, %v1623_v47 }
 0x205   : > { %v581_v10 = vmul.f32 %v1701_v26, %v572_v23  ;;  %v582_v24 = vmul.f32 %v1703_v27, %v571_v16  ;;  %v740_v25 = vsel %vm738_vm10, %v737_v51, %v690_v14  ;;  %v739_v29 = vsel %vm738_vm10, %v736_v5, %v689_v12 }
 0x206   : > { %v756_v34 = vpack.c.bf16 %v740_v25, %v1705_v28  ;;  %v755_v47 = vpack.c.bf16 %v739_v29, %v1714_v32  ;;  %v749_v16 = vsel %vm735_vm5, %v713_v30, %v719_v36  ;;  %v750_v23 = vsel %vm735_vm5, %v714_v33, %v720_v40 }
 0x207   : > { %v695_v43 = vrot.slane %v581_v10, 7  ;;  %v696_v44 = vrot.slane %v582_v24, 7  ;;  %v665_v48 = vpop.permute.xlu1 %664 }
 0x208   : > { %v669_v53 = vsel %vm668_vm11, %v665_v48, %v667_v42  ;;  %v670_v55 = vsel %vm668_vm11, %v667_v42, %v665_v48  ;;  %782 = vmatprep.subr.bf16.mxu0 %v756_v34 }
 0x209   : > { %v679_v56 = vmul.f32 %v1711_v31, %v669_v53  ;;  %v680_v54 = vmul.f32 %v1719_v35, %v670_v55  ;;  %783 = vmatpush1.bf16.msra.mxu0 %v755_v47  ;;  %v742_v57 = vsel %vm735_vm5, %v690_v14, %v696_v44  ;;  %v741_v58 = vsel %vm735_vm5, %v689_v12, %v695_v43 }
 0x20a   : > { %v744_v59 = vsel %vm738_vm10, %v742_v57, %v702_v39  ;;  %v743_v1 = vsel %vm738_vm10, %v741_v58, %v701_v38  ;;  %v1790_v14 = vsel %vm773_vm12, %v1722_v37, 0  ;;  %v752_v39 = vsel %vm738_vm10, %v750_v23, %v726_v50  ;;  %v761_v37 = vld [vmem:[%s1974_s5] sm:$0x3] }
 0x20b   : > { %v731_v7 = vrot.slane %v679_v56, 7  ;;  %v732_v41 = vrot.slane %v680_v54, 7  ;;  %v758_v11 = vpack.c.bf16 %v748_v62, %v744_v59  ;;  %v757_v15 = vpack.c.bf16 %v747_v4, %v743_v1  ;;  %v823_v1 = vld [vmem:[%s1976_s7] sm:$0xf] }
 0x20c   : > { %v751_v38 = vsel %vm738_vm10, %v749_v16, %v725_v49 }
 0x20d   : > { %784 = vmatprep.subr.bf16.mxu0 %v758_v11  ;;  %v754_v8 = vsel %vm735_vm5, %v726_v50, %v732_v41  ;;  %v753_v9 = vsel %vm735_vm5, %v725_v49, %v731_v7  ;;  %v824_v41 = vld [vmem:[%s1977_s8] sm:$0xf] }
 0x20e   : > { %785 = vmatpush1.bf16.msra.mxu0 %v757_v15  ;;  %v760_v12 = vpack.c.bf16 %v754_v8, %v752_v39  ;;  %v759_v51 = vpack.c.bf16 %v753_v9, %v751_v38 }
 0x210   : > { %v780_v5 = vand.u32 %v1790_v14, %v760_v12  ;;  %v777_v10 = vand.u32 %v1790_v14, %v759_v51 }
 0x212   : > { %786 = vmatprep.subr.bf16.mxu0 %v780_v5  ;;  %v1008_v5 = vld [vmem:[%s1979_s10] sm:$0xf] }
 0x213   : > { %787 = vmatpush1.bf16.msra.mxu0 %v777_v10 }
 0x216   : > { %1201 = vmatmul.mubr.msk.bf16.vlgmr.msra.gmra.mrb[0].mxu0 %vm768_vm13, %v761_v37 }
 0x218   : > { %v766_v24 = vpop.permute.xlu1 %765 }
 0x2e9   : > { %v816_v25 = vpop.f32.mrb[0].mxu0 }
 0x2ea   : > { %v817_v29 = vadd.f32 %v816_v25, %v766_v24  ;;  %v818_v30 = vpop.f32.mrb[1].mxu0 }
 0x2eb   : > { %v819_v33 = vadd.f32 %v818_v30, %v766_v24  ;;  %v820_v34 = vpop.f32.mrb[2].mxu0 }
 0x2ec   : > { %v821_v47 = vpop.f32.mrb[3].mxu0  ;;  %v825_v36 = vsel %vm475_vm0, %v817_v29, 0.0  ;;  %v830_v40 = vmul.f32 %v817_v29, %v817_v29 }
 0x2ed   : > { %v826_v42 = vsel %vm475_vm0, %v819_v33, 0.0  ;;  %v831_v43 = vmul.f32 %v819_v33, %v819_v33 }
 0x2ee   : > { %v827_v44 = vadd.f32 %v826_v42, %v825_v36  ;;  %v832_v48 = vsel %vm475_vm0, %v830_v40, 0.0 }
 0x2ef   : > { %v833_v49 = vsel %vm475_vm0, %v831_v43, 0.0 }
 0x2f0   : > { %828 = vadd.xlane.f32.xlu0 %v827_v44  ;;  %v834_v50 = vadd.f32 %v833_v49, %v832_v48 }
 0x2f2   : > { %835 = vadd.xlane.f32.xlu1 %v834_v50 }
 0x37d   : > { %v829_v53 = vpop.xlane.xlu0 %828 }
 0x37e   : > { %v837_v55 = vmul.f32 0.00390625, %v829_v53 }
 0x37f   : > { %v836_v56 = vpop.xlane.xlu1 %835 }
 0x380   : > { %v839_v54 = vmul.f32 %v837_v55, %v837_v55  ;;  %v838_v57 = vmul.f32 0.00390625, %v836_v56 }
 0x382   : > { %v840_v58 = vsub.f32 %v838_v57, %v839_v54 }
 0x384   : > { %v841_v59 = vmax.f32 %v840_v58, 0.0 }
 0x386   : > { %v842_v62 = vadd.f32 1e-05, %v841_v59 }
 0x388   : > { %1272 = vrsqrt.f32 %v842_v62 }
 0x392   : > { %v1273_v4 = vpop.eup %1272 }
 0x393   : > { %v844_v7 = vmul.f32 %v1273_v4, %v823_v1 }
 0x395   : > { %849 = vperm.xlu0 %1268, %v844_v7   ;;  %v845_v11 = vmul.f32 %v844_v7, %v837_v55 }
 0x397   : > { %v846_v15 = vsub.f32 %v824_v41, %v845_v11 }
 0x399   : > { %856 = vperm.xlu1 %1267, %v846_v15  }
 0x414   : > { %v850_v16 = vpop.permute.xlu0 %849 }
 0x415   : > { %v852_v23 = vmul.f32 %v850_v16, %v817_v29  ;;  %v853_v39 = vmul.f32 %v850_v16, %v819_v33 }
 0x418   : > { %v857_v8 = vpop.permute.xlu1 %856 }
 0x419   : > { %v859_v38 = vadd.f32 %v857_v8, %v852_v23  ;;  %v860_v9 = vadd.f32 %v857_v8, %v853_v39 }
 0x41b   : > { %v861_v12 = vmax.f32 %v859_v38, 0.0  ;;  %v862_v51 = vmax.f32 %v860_v9, 0.0 }
 0x41d   : > { %881 = vrot.lane.b32.xlu0 %v862_v51, %s1379_s25  ;;  %863 = vrot.lane.b32.xlu1 %v861_v12, %s1378_s19 }
 0x421   : > { %889 = vrot.lane.b32.xlu0 %v862_v51, %s1380_s29  ;;  %865 = vrot.lane.b32.xlu1 %v862_v51, %s1378_s19 }
 0x425   : > { %899 = vrot.lane.b32.xlu0 %v862_v51, %s1381_s14  ;;  %871 = vrot.lane.b32.xlu1 %v861_v12, %s2004_s26 }
 0x429   : > { %907 = vrot.lane.b32.xlu0 %v862_v51, %s2005_s16  ;;  %873 = vrot.lane.b32.xlu1 %v862_v51, %s2004_s26  ;;  %s1209_s26 = sshll.u32 %s1481_s0, 7  ;;  %s1386_s0 = smov [#allocation6]  }
 0x42a   : > { %s1310_s18 = sshll.u32 %s1386_s0, 4  ;;  %s1311_s18 = int_to_ptr.vmem [resolvable:$false] %s1310_s18 }
 0x42b   : > { %s1312_s17 = scalar_lea.vmem %s1311_s18, 256 }
 0x42d   : > { %915 = vrot.lane.b32.xlu0 %v862_v51, %s2006_s23  ;;  %879 = vrot.lane.b32.xlu1 %v861_v12, %s1379_s25 }
 0x431   : > { %923 = vrot.lane.b32.xlu0 %v862_v51, %s1384_s20  ;;  %887 = vrot.lane.b32.xlu1 %v861_v12, %s1380_s29  ;;  %s1925_s29 = scalar_lea.hbm %s1982_s13, %s1209_s26 }
 0x435   : > { %897 = vrot.lane.b32.xlu1 %v861_v12, %s1381_s14  ;;  %s1108_s14 = scalar_lea.sflag [#allocation5], %s1565_s24 }
 0x439   : > { %905 = vrot.lane.b32.xlu1 %v861_v12, %s2005_s16  ;;  %s2007_s16 = sshll.u32 %s1565_s24, 3 }
 0x43d   : > { %913 = vrot.lane.b32.xlu1 %v861_v12, %s2006_s23  ;;  %s457_s23 = scalar_lea.vmem [#allocation6], %s2007_s16 }
 0x43e   : > { %s1122_s19 = sshll.u32 %s457_s23, 4  ;;  %s1927_s19 = int_to_ptr.vmem [resolvable:$true] %s1122_s19 }
 0x43f   : > { %p1313_p7 = scmp.lt.s32.totalorder %s1927_s19, %s1311_s18 }
 0x441   : > { %921 = vrot.lane.b32.xlu1 %v861_v12, %s1384_s20  ;;  %s1306_s20 = scalar_lea.vmem %s1927_s19, 128 }
 0x442   : > { %p1307_p6 = scmp.ne.s32.totalorder %s1927_s19, %s1306_s20  ;;  %p1314_p10 = scmp.lt.s32.totalorder %s1312_s17, %s1306_s20 }
 0x444   : > { %p1308_p12 = pnand %p1307_p6, %p2008_p11  ;;  %p1315_p2 = por %p1314_p10, %p1313_p7 }
 0x445   : > { %1011 = vperm.xlu1 %1267, %v1008_v5  }
 0x446   : > { %p1309_p13 = pneg %p1308_p12 }
 0x448   : > { %p1316_p4 = pnand %p1315_p2, %p1309_p13 }
 0x48f   : > { %v864_v10 = vpop.permute.xlu1 %863  ;;  %v882_v24 = vpop.permute.xlu0 %881 }
 0x493   : > { %v866_v37 = vpop.permute.xlu1 %865  ;;  %v890_v47 = vpop.permute.xlu0 %889 }
 0x494   : > { %v867_v25 = vsel %vm536_vm6, %v864_v10, %v866_v37  ;;  %v868_v29 = vsel %vm536_vm6, %v866_v37, %v864_v10 }
 0x495   : > { %v869_v33 = vmul.f32 %v868_v29, %v1679_v17  ;;  %v870_v34 = vmul.f32 %v867_v25, %v1681_v18 }
 0x497   : > { %v872_v30 = vpop.permute.xlu1 %871  ;;  %v931_v40 = vrot.slane %v869_v33, 7  ;;  %v932_v42 = vrot.slane %v870_v34, 7  ;;  %v900_v57 = vpop.permute.xlu0 %899 }
 0x499   : > { %v984_v56 = vsel %vm735_vm5, %v1689_v21, %v932_v42  ;;  %v983_v54 = vsel %vm735_vm5, %v1691_v22, %v931_v40 }
 0x49b   : > { %v874_v36 = vpop.permute.xlu1 %873 }
 0x49c   : > { %v875_v43 = vsel %vm553_vm7, %v872_v30, %v874_v36  ;;  %v876_v44 = vsel %vm553_vm7, %v874_v36, %v872_v30 }
 0x49d   : > { %v877_v48 = vmul.f32 %v876_v44, %v1685_v19  ;;  %v878_v49 = vmul.f32 %v875_v43, %v1687_v20 }
 0x49f   : > { %v937_v50 = vrot.slane %v877_v48, 3  ;;  %v938_v53 = vrot.slane %v878_v49, 3  ;;  %v880_v55 = vpop.permute.xlu1 %879 }
 0x4a0   : > { %v883_v17 = vsel %vm570_vm9, %v880_v55, %v882_v24  ;;  %v884_v18 = vsel %vm570_vm9, %v882_v24, %v880_v55 }
 0x4a1   : > { %v986_v19 = vsel %vm738_vm10, %v984_v56, %v938_v53  ;;  %v985_v20 = vsel %vm738_vm10, %v983_v54, %v937_v50  ;;  %v885_v62 = vmul.f32 %v884_v18, %v1701_v26  ;;  %v886_v1 = vmul.f32 %v883_v17, %v1703_v27  ;;  %v908_v26 = vpop.permute.xlu0 %907 }
 0x4a2   : > { %v1002_v58 = vpack.c.bf16 %v986_v19, %v1705_v28  ;;  %v1001_v59 = vpack.c.bf16 %v985_v20, %v1714_v32  ;;  %v896_v28 = vmul.f32 %v862_v51, %v1621_v46  ;;  %v895_v32 = vmul.f32 %v861_v12, %v1619_v45 }
 0x4a3   : > { %v888_v4 = vpop.permute.xlu1 %887  ;;  %v943_v11 = vrot.slane %v885_v62, 7  ;;  %v944_v27 = vrot.slane %v886_v1, 7 }
 0x4a4   : > { %v891_v21 = vsel %vm587_vm1, %v888_v4, %v890_v47  ;;  %v892_v22 = vsel %vm587_vm1, %v890_v47, %v888_v4  ;;  %1023 = vmatprep.subr.bf16.mxu1 %v1002_v58  ;;  %v956_v38 = vrot.slane %v896_v28, 7  ;;  %v955_v46 = vrot.slane %v895_v32, 7 }
 0x4a5   : > { %v893_v7 = vmul.f32 %v892_v22, %v1641_v60  ;;  %v894_v41 = vmul.f32 %v891_v21, %v1643_v61  ;;  %1024 = vmatpush1.bf16.msra.mxu1 %v1001_v59  ;;  %v988_v51 = vsel %vm735_vm5, %v938_v53, %v944_v27  ;;  %v987_v5 = vsel %vm735_vm5, %v937_v50, %v943_v11  ;;  %v1007_v21 = vld [vmem:[%s1978_s9] sm:$0x3] }
 0x4a7   : > { %v898_v15 = vpop.permute.xlu1 %897  ;;  %v949_v16 = vrot.slane %v893_v7, 3  ;;  %v950_v23 = vrot.slane %v894_v41, 3 }
 0x4a8   : > { %v901_v39 = vsel %vm617_vm2, %v898_v15, %v900_v57  ;;  %v902_v8 = vsel %vm617_vm2, %v900_v57, %v898_v15 }
 0x4a9   : > { %v903_v60 = vmul.f32 %v901_v39, %v1647_v63  ;;  %v904_v61 = vmul.f32 %v902_v8, %v1649_v0  ;;  %v990_v10 = vsel %vm738_vm10, %v988_v51, %v950_v23  ;;  %v992_v37 = vsel %vm735_vm5, %v950_v23, %v956_v38  ;;  %v916_v63 = vpop.permute.xlu0 %915 }
 0x4aa   : > { %v989_v24 = vsel %vm738_vm10, %v987_v5, %v949_v16  ;;  %v991_v25 = vsel %vm735_vm5, %v949_v16, %v955_v46 }
 0x4ab   : > { %v961_v9 = vrot.slane %v903_v60, 3  ;;  %v962_v45 = vrot.slane %v904_v61, 3  ;;  %v906_v12 = vpop.permute.xlu1 %905 }
 0x4ac   : > { %v909_v0 = vsel %vm634_vm3, %v906_v12, %v908_v26  ;;  %v910_v29 = vsel %vm634_vm3, %v908_v26, %v906_v12 }
 0x4ad   : > { %v994_v30 = vsel %vm738_vm10, %v992_v37, %v962_v45  ;;  %v993_v33 = vsel %vm738_vm10, %v991_v25, %v961_v9  ;;  %v911_v40 = vmul.f32 %v909_v0, %v1654_v2  ;;  %v912_v42 = vmul.f32 %v910_v29, %v1656_v3  ;;  %v924_v50 = vpop.permute.xlu0 %923  ;;  %v1065_v25 = vld [vmem:[%s1981_s12] sm:$0xf] }
 0x4ae   : > { %v1004_v34 = vpack.c.bf16 %v994_v30, %v990_v10  ;;  %v1003_v47 = vpack.c.bf16 %v993_v33, %v989_v24  ;;  %v1064_v10 = vld [vmem:[%s1980_s11] sm:$0xf] }
 0x4af   : > { %v914_v36 = vpop.permute.xlu1 %913  ;;  %v967_v55 = vrot.slane %v911_v40, 7  ;;  %v968_v17 = vrot.slane %v912_v42, 7 }
 0x4b0   : > { %v917_v43 = vsel %vm651_vm4, %v914_v36, %v916_v63  ;;  %v918_v44 = vsel %vm651_vm4, %v916_v63, %v914_v36  ;;  %1025 = vmatprep.subr.bf16.mxu1 %v1004_v34 }
 0x4b1   : > { %v919_v48 = vmul.f32 %v917_v43, %v1662_v6  ;;  %v920_v49 = vmul.f32 %v918_v44, %v1674_v13  ;;  %1026 = vmatpush1.bf16.msra.mxu1 %v1003_v47  ;;  %v995_v13 = vsel %vm735_vm5, %v961_v9, %v967_v55  ;;  %v996_v20 = vsel %vm735_vm5, %v962_v45, %v968_v17 }
 0x4b3   : > { %v922_v53 = vpop.permute.xlu1 %921  ;;  %v973_v18 = vrot.slane %v919_v48, 3  ;;  %v974_v56 = vrot.slane %v920_v49, 3 }
 0x4b4   : > { %v925_v2 = vsel %vm668_vm11, %v922_v53, %v924_v50  ;;  %v926_v3 = vsel %vm668_vm11, %v924_v50, %v922_v53 }
 0x4b5   : > { %v927_v54 = vmul.f32 %v925_v2, %v1711_v31  ;;  %v928_v57 = vmul.f32 %v926_v3, %v1719_v35  ;;  %v998_v58 = vsel %vm738_vm10, %v996_v20, %v974_v56  ;;  %v997_v62 = vsel %vm738_vm10, %v995_v13, %v973_v18 }
 0x4b7   : > { %v979_v6 = vrot.slane %v927_v54, 7  ;;  %v980_v19 = vrot.slane %v928_v57, 7 }
 0x4b9   : > { %v1000_v59 = vsel %vm735_vm5, %v974_v56, %v980_v19  ;;  %v999_v52 = vsel %vm735_vm5, %v973_v18, %v979_v6 }
 0x4ba   : > { %v1006_v1 = vpack.c.bf16 %v1000_v59, %v998_v58  ;;  %v1005_v4 = vpack.c.bf16 %v999_v52, %v997_v62 }
 0x4bc   : > { %v1021_v31 = vand.u32 %v1006_v1, %v1790_v14  ;;  %v1018_v35 = vand.u32 %v1005_v4, %v1790_v14 }
 0x4be   : > { %1027 = vmatprep.subr.bf16.mxu1 %v1021_v31 }
 0x4bf   : > { %1028 = vmatpush1.bf16.msra.mxu1 %v1018_v35 }
 0x4c2   : > { %1202 = vmatmul.mubr.msk.bf16.vlgmr.msra.gmra.mrb[0].mxu1 %vm768_vm13, %v1007_v21 }
 0x4c4   : > { %v1012_v22 = vpop.permute.xlu1 %1011 }
 0x595   : > { %v1057_v7 = vpop.f32.mrb[0].mxu1 }
 0x596   : > { %v1058_v41 = vadd.f32 %v1057_v7, %v1012_v22  ;;  %v1059_v28 = vpop.f32.mrb[1].mxu1 }
 0x597   : > { %v1060_v32 = vadd.f32 %v1059_v28, %v1012_v22  ;;  %v1061_v26 = vpop.f32.mrb[2].mxu1 }
 0x598   : > { %v1062_v11 = vpop.f32.mrb[3].mxu1  ;;  %v1066_v27 = vsel %vm475_vm0, %v1058_v41, 0.0  ;;  %v1071_v15 = vmul.f32 %v1058_v41, %v1058_v41 }
 0x599   : > { %v1067_v14 = vsel %vm475_vm0, %v1060_v32, 0.0  ;;  %v1072_v16 = vmul.f32 %v1060_v32, %v1060_v32 }
 0x59a   : > { %v1068_v23 = vadd.f32 %v1067_v14, %v1066_v27  ;;  %v1073_v39 = vsel %vm475_vm0, %v1071_v15, 0.0 }
 0x59b   : > { %v1074_v8 = vsel %vm475_vm0, %v1072_v16, 0.0 }
 0x59c   : > { %1069 = vadd.xlane.f32.xlu0 %v1068_v23  ;;  %v1075_v60 = vadd.f32 %v1074_v8, %v1073_v39 }
 0x59e   : > { %1076 = vadd.xlane.f32.xlu1 %v1075_v60 }
 0x629   : > { %v1070_v61 = vpop.xlane.xlu0 %1069 }
 0x62a   : > { %v1078_v38 = vmul.f32 0.00390625, %v1070_v61 }
 0x62b   : > { %v1077_v46 = vpop.xlane.xlu1 %1076 }
 0x62c   : > { %v1080_v9 = vmul.f32 %v1078_v38, %v1078_v38  ;;  %v1079_v45 = vmul.f32 0.00390625, %v1077_v46 }
 0x62e   : > { %v1081_v12 = vsub.f32 %v1079_v45, %v1080_v9 }
 0x630   : > { %v1082_v51 = vmax.f32 %v1081_v12, 0.0 }
 0x632   : > { %v1083_v5 = vadd.f32 1e-05, %v1082_v51 }
 0x634   : > { %1274 = vrsqrt.f32 %v1083_v5 }
 0x63e   : > { %v1275_v37 = vpop.eup %1274 }
 0x63f   : > { %v1085_v24 = vmul.f32 %v1275_v37, %v1064_v10 }
 0x641   : > { %1090 = vperm.xlu0 %1268, %v1085_v24   ;;  %v1086_v63 = vmul.f32 %v1085_v24, %v1078_v38 }
 0x643   : > { %v1087_v0 = vsub.f32 %v1065_v25, %v1086_v63 }
 0x645   : > { %1097 = vperm.xlu1 %1267, %v1087_v0  }
 0x6c0   : > { %v1091_v29 = vpop.permute.xlu0 %1090 }
 0x6c1   : > { %v1093_v30 = vmul.f32 %v1091_v29, %v1058_v41  ;;  %v1094_v33 = vmul.f32 %v1091_v29, %v1060_v32 }
 0x6c4   : > { %v1098_v34 = vpop.permute.xlu1 %1097 }
 0x6c5   : > { %v1100_v47 = vadd.f32 %v1098_v34, %v1093_v30  ;;  %v1101_v36 = vadd.f32 %v1098_v34, %v1094_v33 }
 0x6c7   : > { %v1104_v40 = vcombine.low %v1100_v47, %v1101_v36 }
 0x6c9   : > { %1106 = vst [vmem:[%s457_s23] sm:$0xff] %v1104_v40 }
 0x6ca   : > { %1319 = shalt.err (!%p1316_p4)
}
 0x6cb   : > { %s1320_s24 = scalar_lea.hbm %s1925_s29, 128  ;;  %s1324_s23 = scalar_lea.hbm %s1982_s13, 256 }
 0x6cc   : > { %p1321_p5 = scmp.ne.s32.totalorder %s1925_s29, %s1320_s24  ;;  %p1325_p0 = scmp.lt.u32.totalorder %s1925_s29, %s1982_s13 }
 0x6cd   : > { %p1326_p1 = scmp.lt.u32.totalorder %s1324_s23, %s1320_s24  ;;  %p1328_p6 = scmp.lt.u32.totalorder %s1320_s24, %s1925_s29 }
 0x6ce   : > { %p1322_p8 = pnand %p1321_p5, %p2008_p11 }
 0x6cf   : > { %p1327_p3 = por %p1326_p1, %p1325_p0 }
 0x6d0   : > { %p1323_p9 = pneg %p1322_p8 }
 0x6d1   : > { %p1329_p12 = por %p1328_p6, %p1327_p3 }
 0x6d3   : > { %p1330_p13 = pnand %p1329_p12, %p1323_p9 }
 0x6d5   : > { %1333 = shalt.err (!%p1330_p13)
}
 0x6d6   : > { %1212 = dma.vmem_to_hbm [thread:$0]  (%p2008_p11), %s1927_s19, 128, %s1925_s29, %s1108_s14  }
 0x6d7 PF: > { %s1134_s20 = sand.u32 1, %s1360_s27   ;;  %p2009_p7 = scmp.ne.s32.totalorder %s2000_s22, 0 }
 0x6d8   : > { %p2010_p10 = scmp.ge.s32.totalorder %s1372_s30, 2  ;;  %s1135_s0 = scalar_lea.sflag [#allocation5], %s1134_s20 }
 0x6da   : > { %p1219_p2 = pnand %p2010_p10, %p2009_p7 }
 0x6dc   : > { %1355 = dma.done.wait (!%p1219_p2), %s1135_s0, 128  }
 0x6dd   : > { %1357 = vsyncadd (!%p1219_p2), %s1135_s0, 4294967168  ;;  %s2011_s30 = sld [smem:[#allocation10_spill]]  ;;  %s2012_s18 = sld [smem:[#allocation9_spill]] }
 0x6de   : > { %s2013_s29 = sld [smem:[#allocation11_spill]]  ;;  %s2014_s27 = smov %s1364_s28 }
 0x6e3   : > { %p27_p4 = scmp.ge.s32.totalorder %s2011_s30, 4   ;;  %s2015_s28 = smov %s2012_s18 }
 0x6e5   :  { %29 = sbr.rel (!%p27_p4) target bundleno = 7 (0x7), region = 117 }
 0x6ec   :  { %1140 = vsyncpa [#allocation4], 1 }
 0x6ed   :  { %1142 = vsyncpa [#allocation4 + $0x1], 1 }
 0x6ee   :  { %1143 = vsyncpa [#allocation5], 1 }
 0x6ef   :  { %1145 = vsyncpa [#allocation5 + $0x1], 1 }

</bundles_post_ra>
